<compile_context>
chip_gen: v5e
topology: v5e:2x2
jax: 0.10.0
libtpu: 0.0.40
codegen_flags: <defaults>
</compile_context>

<pallas_src>
import math

import jax
import jax.numpy as jnp
from jax.experimental import pallas as pl
from jax.experimental.pallas import tpu as pltpu


def _temp_scale_kernel(temp_ref, x_ref, o_ref):
    # temp_ref: (1,) f32 scalar in SMEM; x_ref / o_ref: (row_tile, lane) VMEM tiles.
    inv_t = 1.0 / temp_ref[0]                               # scalar reciprocal, once per tile
    o_ref[...] = (x_ref[...] * inv_t).astype(o_ref.dtype)   # one VPU multiply per vreg


def _device_defaults():
    """Per-TPU-generation (max_tile_bytes, vmem_limit_bytes, can_core_parallel)."""
    kind = ""
    try:
        kind = jax.devices()[0].device_kind.lower()
    except Exception:
        pass
    if "v7" in kind:
        # 64 MiB VMEM, ~3.2 TB/s, 2 TCs: large tiles + explicit vmem limit + 2-TC sharding.
        return 8 << 20, 48 << 20, True
    if "v5" in kind:
        # 16 MiB scoped-VMEM default: 2 MiB tiles (8 MiB with in+out double buffering).
        return 2 << 20, None, False
    # v6e / unknown: 4 MiB tiles (16 MiB double-buffered) stay under the 32 MiB default.
    return 4 << 20, None, False


def temperature_scaling(logits: jax.Array, temperature, *, max_tile_bytes: int | None = None,
                        min_pallas_bytes: int = 64 * 1024) -> jax.Array:
    """out = logits / temperature, streamed through a tiled lane-dense Pallas kernel."""
    orig_shape = logits.shape
    dtype = logits.dtype
    n = math.prod(orig_shape) if orig_shape else 1
    itemsize = jnp.dtype(dtype).itemsize

    temp = jnp.asarray(temperature, dtype=jnp.float32).reshape(1)

    # ---- tiny / empty inputs: kernel launch cost dominates -> plain XLA ----------
    if n == 0 or n * itemsize < min_pallas_bytes:
        return (logits / temp[0]).astype(dtype)

    default_tile, vmem_limit, can_core_parallel = _device_defaults()
    if max_tile_bytes is None:
        max_tile_bytes = default_tile

    # ---- lane-dense 2-D view (rows, lane), lane a multiple of 128 ----------------
    lane = None
    for cand in (1024, 512, 256, 128):
        if n % cand == 0:
            lane = cand
            break
    flat = logits.reshape(-1)
    padded = False
    if lane is None:
        # Truly ragged element count (n % 128 != 0): pad to the next lane multiple.
        # Only this rare path copies; realistic (batch, vocab) logits never hit it.
        lane = 128
        rows = pl.cdiv(n, lane)
        flat = jnp.pad(flat, (0, rows * lane - n))
        padded = True
    else:
        rows = n // lane
    x2d = flat.reshape(rows, lane)

    # ---- row tiling ---------------------------------------------------------------
    # Sublane-packing multiple: 8 rows for 4-byte, 16 for 2-byte, 32 for 1-byte dtypes.
    sublane = max(8, 32 // itemsize)
    total_bytes = n * itemsize
    if rows <= sublane:
        row_tile = rows                            # full row extent: always legal
    else:
        bytes_per_row = lane * itemsize
        max_rows = max(sublane, (max_tile_bytes // bytes_per_row) // sublane * sublane)
        row_tile = min(max_rows, max(sublane, (rows // sublane) * sublane))
        if total_bytes > (2 << 20):
            # Never a near-1-step grid for big arrays: >=4 steps lets the BlockSpec
            # pipeline overlap input DMA, VPU multiply, and output DMA.
            quarter = max(sublane, (pl.cdiv(rows, 4) // sublane) * sublane)
            row_tile = min(row_tile, quarter)
    grid_steps = pl.cdiv(rows, row_tile)           # trailing partial block is masked by Pallas

    # v7x: real dual-TensorCore sharding of the row axis; elsewhere plain PARALLEL.
    dim_sem = pltpu.CORE_PARALLEL if (can_core_parallel and grid_steps >= 2) else pltpu.PARALLEL
    cp_kwargs = dict(dimension_semantics=(dim_sem,))
    if vmem_limit is not None:
        cp_kwargs["vmem_limit_bytes"] = vmem_limit

    out2d = pl.pallas_call(
        _temp_scale_kernel,
        out_shape=jax.ShapeDtypeStruct((rows, lane), dtype),
        grid=(grid_steps,),
        in_specs=[
            pl.BlockSpec(memory_space=pltpu.MemorySpace.SMEM),     # temperature scalar
            pl.BlockSpec((row_tile, lane), lambda i: (i, 0)),      # logits tile
        ],
        out_specs=pl.BlockSpec((row_tile, lane), lambda i: (i, 0)),
        compiler_params=pltpu.CompilerParams(**cp_kwargs),
        cost_estimate=pl.CostEstimate(flops=n, transcendentals=0,
                                      bytes_accessed=2 * n * itemsize + 4),
    )(temp, x2d)

    out_flat = out2d.reshape(-1)
    if padded:
        out_flat = out_flat[:n]
    return out_flat.reshape(orig_shape)


if __name__ == "__main__":
    k0, k1, k2, k3 = jax.random.split(jax.random.PRNGKey(0), 4)

    # Matches nn.Parameter(torch.ones(1) * temperature)
    temperature_init = 1.5
    temperature = jnp.ones((1,), dtype=jnp.float32) * temperature_init

    # 1) Typical small (batch, num_classes) calibration logits -> XLA fast path.
    x1 = jax.random.normal(k0, (2, 16), dtype=jnp.float32)
    # 2) Lane-dense shape forced through a multi-step gridded kernel
    #    (tiny max_tile_bytes so the pipeline runs several steps at small test sizes).
    x2 = jax.random.normal(k1, (64, 1024), dtype=jnp.float32)
    # 3) Odd element count exercising the ragged flatten+pad fallback kernel path.
    x3 = jax.random.normal(k2, (3, 5, 7), dtype=jnp.float32)
    # 4) Row count not a multiple of the row tile -> masked trailing partial block.
    x4 = jax.random.normal(k3, (100, 384), dtype=jnp.float32)

    cases = (
        (x1, {}),
        (x2, {"min_pallas_bytes": 0, "max_tile_bytes": 32 * 1024}),
        (x3, {"min_pallas_bytes": 0}),
        (x4, {"min_pallas_bytes": 0, "max_tile_bytes": 64 * 1024}),
    )
    for x, kw in cases:
        out = jax.block_until_ready(temperature_scaling(x, temperature, **kw))
        ref = x / temperature
        assert out.shape == x.shape and out.dtype == x.dtype
        assert jnp.allclose(out, ref, atol=1e-6, rtol=1e-5), f"mismatch at shape {x.shape}"

    print("KERNEL_OK")
</pallas_src>

<mosaic_0001>
module attributes {stable_mosaic.version = 11 : i64} {
  func.func @_temp_scale_kernel(%arg0: i32, %arg1: memref<1xf32, #tpu.memory_space<smem>>, %arg2: memref<8x1024xf32, #tpu.memory_space<vmem>>, %arg3: memref<8x1024xf32, #tpu.memory_space<vmem>>) attributes {dimension_semantics = [#tpu.dimension_semantics<parallel>], iteration_bounds = array<i64: 8>, scalar_prefetch = 0 : i64, scratch_operands = 0 : i64, tpu.core_type = #tpu.core_type<tc>, window_params = [{transform_indices = @transform_0, window_bounds = array<i64: 1>}, {transform_indices = @transform_1, window_bounds = array<i64: 8, 1024>}, {transform_indices = @transform_2, window_bounds = array<i64: 8, 1024>}]} {
    %c0 = arith.constant 0 : index
    %0 = memref.load %arg1[%c0] : memref<1xf32, #tpu.memory_space<smem>>
    %cst = arith.constant 1.000000e+00 : f32
    %1 = arith.divf %cst, %0 : f32
    %c0_0 = arith.constant 0 : index
    %c0_1 = arith.constant 0 : index
    %2 = vector.load %arg2[%c0_0, %c0_1] : memref<8x1024xf32, #tpu.memory_space<vmem>>, vector<8x1024xf32>
    %3 = vector.broadcast %1 : f32 to vector<8x1024xf32>
    %4 = arith.mulf %2, %3 : vector<8x1024xf32>
    %c0_2 = arith.constant 0 : index
    %c0_3 = arith.constant 0 : index
    %5 = vector.load %arg3[%c0_2, %c0_3] : memref<8x1024xf32, #tpu.memory_space<vmem>>, vector<8x1024xf32>
    tpu.vector_store %arg3[%c0_2, %c0_3], %4 {strides = array<i32>} : memref<8x1024xf32, #tpu.memory_space<vmem>>, vector<8x1024xf32>,
    return
  }
  func.func @transform_0(%arg0: i32) -> i32 {
    %c0_i32 = arith.constant 0 : i32
    %c0_i32_0 = arith.constant 0 : i32
    return %c0_i32 : i32
  }
  func.func @transform_1(%arg0: i32) -> (i32, i32) {
    %c0_i32 = arith.constant 0 : i32
    %c0_i32_0 = arith.constant 0 : i32
    return %arg0, %c0_i32 : i32, i32
  }
  func.func @transform_2(%arg0: i32) -> (i32, i32) {
    %c0_i32 = arith.constant 0 : i32
    %c0_i32_0 = arith.constant 0 : i32
    return %arg0, %c0_i32 : i32, i32
  }
}

</mosaic_0001>

<bundles_post_ra>
// kernel: tpu_custom_call.1
= control target key start
LH: loop header
LB: loop body
LE: loop exit
PB: predicated region body
PF: predicated region fallthrough
CT: control target
= control target key end

     0   :  { %s613_s0 = inlined_call_operand.<no memory space> [shape: f32[1], index: 0, kind: input, shape index: {}]   ;;  %s614_s1 = inlined_call_operand.hbm [shape: f32[64,1024], index: 1, kind: input, shape index: {}]   ;;  %s615_s2 = inlined_call_operand.hbm [shape: f32[64,1024], index: 2, kind: output, shape index: {}]  }
   0x1   :  { %7 = sst [smem:[#allocation2]] %s613_s0 }
   0x2   :  { %8 = vsyncpa [#allocation4], 0 }
   0x3   :  { %10 = vsyncpa [#allocation4 + $0x1], 0 }
   0x4   :  { %11 = vsyncpa [#allocation5], 0 }
   0x5   :  { %13 = vsyncpa [#allocation5 + $0x1], 0  ;;  %s474_s11 = smov 0   ;;  %s476_s12 = smov 0  }
   0x6   :  { %s478_s13 = smov 0   ;;  %s480_s14 = smov 0  }
   0x7 LB: > { %s495_s0 = sadd.s32 4294967295, %s454_s14   ;;  %s292_s15 = sadd.s32 4294967294, %s454_s14   ;;  %s454_s14 = sphi %s480_s14, %s624_s14   ;;  %s450_s13 = sphi %s478_s13, %s623_s13   ;;  %s446_s12 = sphi %s476_s12, %s622_s12   ;;  %s442_s11 = sphi %s474_s11, %s621_s11  }
   0x8   : > { %s499_s16 = sadd.s32 1, %s454_s14   ;;  %s47_s17 = sadd.s32 1, %s450_s13 }
   0x9   : > { %s44_s18 = ssub.s32 %s454_s14, %s499_s16  ;;  %p54_p0 = scmp.ne.s32.totalorder %s450_s13, %s446_s12 }
   0xa   : > { %p45_p1 = scmp.eq.s32.totalorder %s44_s18, 0  ;;  %p55_p2 = scmp.eq.s32.totalorder %s454_s14, 0 }
   0xb   : > { %p60_p3 = scmp.ne.s32.totalorder %s446_s12, %s442_s11  ;;  %p61_p4 = scmp.eq.s32.totalorder %s495_s0, 0 }
   0xc   : > { %s511_s19 = scalar_select %p45_p1, %s450_s13, %s47_s17  }
   0xd   : > { %p513_p5 = por %p55_p2, %p54_p0  ;;  %p517_p6 = por %p61_p4, %p60_p3 }
   0xe   : > { %p84_p7 = scmp.eq.s32.totalorder %s495_s0, 7  ;;  %p90_p8 = scmp.eq.s32.totalorder %s292_s15, 7 }
   0xf   : > { %p322_p9 = scmp.lt.s32.totalorder %s454_s14, 8  ;;  %s113_s24 = sand.u32 1, %s450_s13  }
  0x10   : > { %p523_p10 = por %p84_p7, %p54_p0  ;;  %p527_p11 = por %p90_p8, %p60_p3 }
  0x11   : > { %s306_s25 = sshll.u32 %s454_s14, 6  ;;  %s295_s26 = sshll.u32 %s113_s24, 6 }
  0x12   : > { %s122_s29 = scalar_lea.hbm %s614_s1, %s306_s25  ;;  %s117_s3 = scalar_lea.vmem [#allocation3], %s295_s26 }
  0x13   : > { %s124_s30 = sshll.u32 %s122_s29, 4  ;;  %s126_s4 = sshll.u32 %s117_s3, 4  ;;  %s125_s30 = int_to_ptr.hbm [resolvable:$true] %s124_s30  ;;  %s127_s4 = int_to_ptr.vmem [resolvable:$true] %s126_s4 }
  0x14   : > { %p538_p12 = pnand %p322_p9, %p513_p5  ;;  %p298_p13 = scmp.ge.s32.totalorder %s454_s14, 1 }
  0x15   : > { %p131_p0 = scmp.lt.s32.totalorder %s454_s14, 9  ;;  %s114_s6 = scalar_lea.sflag [#allocation4], %s113_s24 }
  0x16   : > { %s358_s7 = sshra.s32 %s125_s30, 4  ;;  %p362_p2 = pneg %p538_p12  ;;  %s359_s7 = int_to_ptr.hbm [resolvable:$true] %s358_s7 }
  0x17   : > { %s360_s8 = scalar_lea.hbm %s359_s7, 64  ;;  %s365_s15 = scalar_lea.hbm %s614_s1, 512 }
  0x18   : > { %p361_p1 = scmp.ne.s32.totalorder %s359_s7, %s360_s8  ;;  %p366_p5 = scmp.lt.s32.totalorder %s359_s7, %s614_s1 }
  0x19   : > { %p367_p7 = scmp.lt.s32.totalorder %s365_s15, %s360_s8 }
  0x1a   : > { %p363_p3 = pnand %p362_p2, %p361_p1 }
  0x1b   : > { %p368_p8 = por %p367_p7, %p366_p5 }
  0x1c   : > { %p364_p4 = pneg %p363_p3 }
  0x1e   : > { %p369_p9 = pnand %p368_p8, %p364_p4 }
  0x20   : > { %372 = shalt.err (!%p369_p9)
}
  0x21   : > { %317 = dma.hbm_to_vmem [thread:$0]  (!%p538_p12), %s125_s30, 1024, %s127_s4, %s114_s6  }
  0x22   : > { %p132_p1 = pnand %p298_p13, %p131_p0 }
  0x23   : > { %s559_s20 = sand.u32 (!%p132_p1), 1, %s446_s12  }
  0x24   : > { %135 = sbr.rel (%p132_p1) target bundleno = 129 (0x81), region = 28  ;;  %s299_s24 = sshll.u32 (!%p132_p1), %s559_s20, 6 }
  0x25   : > { %s138_s25 = scalar_lea.sflag (!%p132_p1), [#allocation4], %s559_s20  ;;  %s565_s26 = scalar_lea.vmem (!%p132_p1), [#allocation3], %s299_s24 }
  0x29   : > { %433 = dma.done.wait (%p517_p6), %s138_s25, 1024  }
  0x2a   : > { %435 = vsyncadd (%p517_p6), %s138_s25, 4294966272  ;;  %s163_s27 = sld [smem:[#allocation2]]  ;;  %v180_v11 = vld [vmem:[%s565_s26] sm:$0xff]  ;;  %v181_v12 = vld [vmem:[%s565_s26 + $0x8] sm:$0xff]  ;;  %s307_s28 = sshll.u32 %s495_s0, 6 }
  0x2b   : > { %v182_v13 = vld [vmem:[%s565_s26 + $0x10] sm:$0xff]  ;;  %v183_v14 = vld [vmem:[%s565_s26 + $0x18] sm:$0xff]  ;;  %v184_v15 = vld [vmem:[%s565_s26 + $0x20] sm:$0xff]  ;;  %s217_s3 = scalar_lea.hbm %s615_s2, %s307_s28  ;;  %s162_s4 = scalar_lea.vmem [#allocation6], %s299_s24 }
  0x2c   : > { %v185_v17 = vld [vmem:[%s565_s26 + $0x28] sm:$0xff]  ;;  %v186_v21 = vld [vmem:[%s565_s26 + $0x30] sm:$0xff]  ;;  %v187_v23 = vld [vmem:[%s565_s26 + $0x38] sm:$0xff]  ;;  %s219_s0 = sshll.u32 %s162_s4, 4  ;;  %s221_s5 = sshll.u32 %s217_s3, 4  ;;  %s220_s0 = int_to_ptr.vmem [resolvable:$true] %s219_s0  ;;  %s222_s5 = int_to_ptr.hbm [resolvable:$true] %s221_s5 }
  0x2d   : > { %s206_s6 = scalar_lea.sflag [#allocation5], %s559_s20  ;;  %s402_s7 = sshra.s32 %s222_s5, 4  ;;  %s403_s7 = int_to_ptr.hbm [resolvable:$true] %s402_s7 }
  0x2e   : > { %s404_s8 = scalar_lea.hbm %s403_s7, 64  ;;  %s408_s15 = scalar_lea.hbm %s615_s2, 512 }
  0x2f   : > { %p405_p6 = scmp.ne.s32.totalorder %s403_s7, %s404_s8  ;;  %p409_p0 = scmp.lt.s32.totalorder %s403_s7, %s615_s2 }
  0x30   : > { %v164_v0 = vstv %s163_s27  ;;  %p410_p2 = scmp.lt.s32.totalorder %s408_s15, %s404_s8 }
  0x31   : > { %356 = vrcp.f32 %v164_v0  ;;  %v176_v3 = vand.u32 2147483648, %v164_v0  ;;  %vm170_vm0 = vweird.f32 %v164_v0  ;;  %v174_v5 = vand.u32 2147483647, %v164_v0  ;;  %p406_p12 = pnand %p405_p6, %p523_p10 }
  0x32   : > { %p411_p3 = por %p410_p2, %p409_p0 }
  0x33   : > { %v177_v7 = vor.u32 1.1754944e-38, %v176_v3  ;;  %vm175_vm3 = vcmp.eq.f32.partialorder %v174_v5, 8.507059e+37  ;;  %p407_p13 = pneg %p406_p12 }
  0x35   : > { %p412_p4 = pnand %p411_p3, %p407_p13 }
  0x37   : > { %v357_v1 = vpop.eup %356 }
  0x38   : > { %v166_v2 = vmul.f32 %v357_v1, %v164_v0  ;;  %vm171_vm1 = vweird.f32 %v357_v1 }
  0x39   : > { %vm172_vm2 = vmor %vm170_vm0, %vm171_vm1 }
  0x3a   : > { %v167_v4 = vsub.f32 1.0, %v166_v2 }
  0x3c   : > { %v168_v6 = vmul.f32 %v357_v1, %v167_v4 }
  0x3e   : > { %v169_v8 = vadd.f32 %v357_v1, %v168_v6 }
  0x40   : > { %v173_v9 = vsel %vm172_vm2, %v357_v1, %v169_v8 }
  0x41   : > { %v178_v10 = vsel %vm175_vm3, %v177_v7, %v173_v9 }
  0x42   : > { %308 = vpush %v178_v10 }
  0x73   : > { %s309_s21 = spop %308 }
  0x74   : > { %v188_v16 = vstv %s309_s21 }
  0x75   : > { %v189_v18 = vmul.f32 %v188_v16, %v180_v11  ;;  %v190_v19 = vmul.f32 %v188_v16, %v181_v12  ;;  %v191_v20 = vmul.f32 %v188_v16, %v182_v13  ;;  %v192_v22 = vmul.f32 %v188_v16, %v183_v14 }
  0x76   : > { %v193_v24 = vmul.f32 %v188_v16, %v184_v15  ;;  %v194_v25 = vmul.f32 %v188_v16, %v185_v17  ;;  %v195_v26 = vmul.f32 %v188_v16, %v186_v21  ;;  %v196_v27 = vmul.f32 %v188_v16, %v187_v23 }
  0x77   : > { %197 = vst [vmem:[%s162_s4] sm:$0xff] %v189_v18 }
  0x78   : > { %198 = vst [vmem:[%s162_s4 + $0x8] sm:$0xff] %v190_v19 }
  0x79   : > { %199 = vst [vmem:[%s162_s4 + $0x10] sm:$0xff] %v191_v20 }
  0x7a   : > { %200 = vst [vmem:[%s162_s4 + $0x18] sm:$0xff] %v192_v22 }
  0x7b   : > { %201 = vst [vmem:[%s162_s4 + $0x20] sm:$0xff] %v193_v24 }
  0x7c   : > { %202 = vst [vmem:[%s162_s4 + $0x28] sm:$0xff] %v194_v25 }
  0x7d   : > { %203 = vst [vmem:[%s162_s4 + $0x30] sm:$0xff] %v195_v26 }
  0x7e   : > { %204 = vst [vmem:[%s162_s4 + $0x38] sm:$0xff] %v196_v27 }
  0x7f   : > { %415 = shalt.err (!%p412_p4)
}
  0x80   : > { %312 = dma.vmem_to_hbm [thread:$0]  (%p523_p10), %s220_s0, 1024, %s222_s5, %s206_s6  }
  0x81 PF: > { %p323_p5 = scmp.ge.s32.totalorder %s454_s14, 2  ;;  %s233_s20 = sand.u32 1, %s442_s11  }
  0x82   : > { %s234_s24 = scalar_lea.sflag [#allocation5], %s233_s20 }
  0x83   : > { %p319_p7 = pnand %p323_p5, %p527_p11 }
  0x85   : > { %p320_p8 = pneg %p319_p7 }
  0x87   : > { %437 = dma.done.wait (%p320_p8), %s234_s24, 1024  }
  0x88   : > { %439 = vsyncadd (%p320_p8), %s234_s24, 4294966272  ;;  %p16_p9 = scmp.ge.s32.totalorder %s499_s16, 10   ;;  %s621_s11 = smov %s446_s12 }
  0x89   : > { %s622_s12 = smov %s450_s13  ;;  %s623_s13 = smov %s511_s19 }
  0x8a   : > { %s624_s14 = smov %s499_s16  ;;  %18 = sbr.rel (!%p16_p9) target bundleno = 7 (0x7), region = 73 }
  0x8f   :  { %240 = vsyncpa [#allocation4], 1 }
  0x90   :  { %242 = vsyncpa [#allocation4 + $0x1], 1 }
  0x91   :  { %243 = vsyncpa [#allocation5], 1 }
  0x92   :  { %245 = vsyncpa [#allocation5 + $0x1], 1 }

</bundles_post_ra>
